<compile_context>
chip_gen: v6e
topology: v6e:2x2x1
jax: 0.10.0
libtpu: 0.0.40
codegen_flags: <defaults>
</compile_context>

<pallas_src>
import functools

import jax
import jax.numpy as jnp
from jax.experimental import pallas as pl
from jax.experimental.pallas import tpu as pltpu

_LN_EPS = 1e-5


def _cdiv(a, b):
    return -(-a // b)


def _round_up(a, m):
    return _cdiv(a, m) * m


def _apply_activation(t, activation):
    # TODO(synk): `self.activation` is undefined in the source module; ReLU (id 0) by default.
    if activation == 0:
        return jnp.maximum(t, 0.0)
    if activation == 1:
        return jnp.tanh(t)
    if activation == 2:
        return jax.nn.sigmoid(t)
    if activation == 3:
        return t
    raise ValueError(f"Unknown activation function: {activation}")


def _lane_roll(x, shift):
    """jnp.roll(x, shift, axis=-1) written explicitly as two static lane slices + concat
    (direction-unambiguous; lowers to cheap XLU shuffles, VALU slot untouched)."""
    if shift == 0:
        return x
    n = x.shape[-1]
    shift = shift % n
    return jnp.concatenate([x[:, n - shift:], x[:, :n - shift]], axis=-1)


def _nas_kernel(wd_ref, x_ref, gamma_ref, beta_ref, o_ref, *,
                num_layers, k, num_samples, activation):
    # wd_ref:    (Bblk, L, k, k*S)  rotation-aligned expanded weights (lane-dense)
    # x_ref:     (Bblk, k*S)        flattened (k, S) per batch element
    # gamma_ref: (1, k*S)           LayerNorm weight
    # beta_ref:  (1, k*S)           LayerNorm bias
    # o_ref:     (Bblk, k*S)
    f32 = jnp.float32
    n = k * num_samples
    inv_n = 1.0 / float(n)

    x = x_ref[...]
    if x.dtype != f32:
        x = x.astype(f32)
    gamma = gamma_ref[...]
    beta = beta_ref[...]
    if gamma.dtype != f32:
        gamma = gamma.astype(f32)
    if beta.dtype != f32:
        beta = beta.astype(f32)

    # Static unroll over layers (num_layers is small).
    # TODO(synk): for large num_layers switch to lax.fori_loop / a layer grid axis so live
    # ranges stay bounded and per-layer weight DMAs pipeline.
    for i in range(num_layers):
        # ---- lane-dense VPU contraction (no MXU) ---------------------------------
        #   t[b, r*S+s] = sum_j W[b,i,r,j] * x[b, j*S+s]
        #               = sum_d roll(x, d*S)[b, r*S+s] * wd[b,i,d, r*S+s]
        t = None
        for d in range(k):
            w_id = wd_ref[:, i, d, :]                       # (Bblk, k*S)
            if w_id.dtype != f32:
                w_id = w_id.astype(f32)
            term = _lane_roll(x, d * num_samples) * w_id
            t = term if t is None else t + term

        # ---- LayerNorm over all k*S elements: one lane-reduce per pass -----------
        mu = jnp.sum(t, axis=-1, keepdims=True) * inv_n     # (Bblk, 1)
        tc = t - mu
        var = jnp.sum(tc * tc, axis=-1, keepdims=True) * inv_n
        t = tc * jax.lax.rsqrt(var + _LN_EPS)
        t = t * gamma + beta                                # (1, n) rows, sublane-broadcast

        if i % 2 == 0:
            t = _apply_activation(t, activation)

        x = x + t if i > 0 else t                           # residual connection

    o_ref[...] = x.astype(o_ref.dtype)                      # single lane-dense store


def _vmem_limit_bytes():
    """Chip-aware scoped-VMEM limit (v7x: 64 MiB physical; v5e/v6e: 128 MiB)."""
    cap = 64 * 1024 * 1024
    try:
        info = pltpu.get_tpu_info()
        cap = int(getattr(info, "vmem_capacity_bytes", cap))
    except Exception:       # no TPU info available -> conservative default
        pass
    return min((cap * 3) // 4, 96 * 1024 * 1024)


def _plan_blocks(batch_size, per_elem_bytes, block_budget_bytes):
    """Choose (num_blocks, block_batch).

    * single grid step whenever the whole batch fits the per-block budget
      (no forced split on single-TC v5e/v6e; zero per-step overhead for tiny batches);
    * otherwise sublane-aligned blocks with an even step count so a v7x megacore split
      is balanced; batch is padded up to num_blocks * block_batch by the caller."""
    max_block = max(1, block_budget_bytes // per_elem_bytes)
    if max_block >= batch_size:
        return 1, batch_size
    block = max(8, (max_block // 8) * 8)
    nb = _cdiv(batch_size, block)
    if nb == 1:
        return 1, batch_size
    if nb % 2 == 1:
        nb += 1
        block = max(8, _round_up(_cdiv(batch_size, nb), 8))
    return nb, block


def dynamic_nn_nas_forward(weights, x, gamma, beta, *, num_layers, k, num_samples,
                           activation=0, max_block_io_bytes=None):
    """weights: (B, num_layers*k*k); x: (k, S) or (B, k, S); gamma/beta: (k, S)."""
    batch_size = weights.shape[0]
    S = num_samples
    n = k * S

    # Replicate the PyTorch input-shape handling.
    if x.ndim == 2 and x.shape[0] == k:
        x3 = jnp.broadcast_to(x[None, :, :], (batch_size, k, S))
    elif x.ndim == 3 and x.shape[0] == batch_size and x.shape[1] == k:
        x3 = x
    else:
        raise ValueError(f"Unexpected shape for x: {x.shape}")
    x_flat = x3.reshape(batch_size, n)                       # lane-dense last axis (k*S)

    # torch.chunk(weights, L, dim=1) + view(B, k, k)  ==  reshape to (B, L, k, k)
    w4 = weights.reshape(batch_size, num_layers, k, k)

    # Rotation-aligned, lane-dense weight expansion for the in-kernel VPU contraction:
    #   wd[b, l, d, r*S + s] = w4[b, l, r, (r - d) % k]
    # so that  sum_d roll(x_flat, d*S) * wd[:, l, d, :]  ==  bmm(W_l, x)  per batch element.
    # Last axis is k*S: weight blocks are VMEM-dense (no (8,8)->(8,128) padding) and DMA'd
    # contiguously.
    r_idx = jnp.arange(k)
    d_idx = jnp.arange(k)[:, None]
    j_idx = (r_idx[None, :] - d_idx) % k                     # (d, r) -> source column j
    wd = w4[:, :, r_idx[None, :], j_idx]                     # (B, L, k_d, k_r)
    wd = jnp.repeat(wd, S, axis=-1)                          # (B, L, k, k*S)

    gamma2 = gamma.reshape(1, n)
    beta2 = beta.reshape(1, n)

    # ---- chip-aware blocking over the batch --------------------------------------
    vmem_limit = _vmem_limit_bytes()
    per_elem_bytes = (num_layers * k * n) * jnp.dtype(wd.dtype).itemsize \
        + 2 * n * jnp.dtype(x_flat.dtype).itemsize
    if max_block_io_bytes is None:
        max_block_io_bytes = min(vmem_limit // 4, 16 * 1024 * 1024)
    num_blocks, block_batch = _plan_blocks(batch_size, per_elem_bytes, max_block_io_bytes)
    padded_b = num_blocks * block_batch
    if padded_b != batch_size:
        pad = padded_b - batch_size
        x_flat = jnp.pad(x_flat, ((0, pad), (0, 0)))
        wd = jnp.pad(wd, ((0, pad), (0, 0), (0, 0), (0, 0)))

    kernel = functools.partial(
        _nas_kernel, num_layers=num_layers, k=k, num_samples=S, activation=activation)

    # Advisory cost estimate: kernel is tiny at reference shapes; an accurate hint lets
    # XLA overlap it with surrounding ops.
    flops = 2 * batch_size * num_layers * k * k * S + 8 * batch_size * num_layers * n
    bytes_accessed = int(wd.size) * jnp.dtype(wd.dtype).itemsize \
        + 2 * int(x_flat.size) * jnp.dtype(x_flat.dtype).itemsize \
        + 2 * n * jnp.dtype(gamma2.dtype).itemsize
    cost = pl.CostEstimate(flops=int(flops),
                           transcendentals=int(batch_size * num_layers),
                           bytes_accessed=int(bytes_accessed))

    out_flat = pl.pallas_call(
        kernel,
        out_shape=jax.ShapeDtypeStruct((padded_b, n), x_flat.dtype),
        grid_spec=pltpu.PrefetchScalarGridSpec(
            num_scalar_prefetch=0,
            grid=(num_blocks,),
            in_specs=[
                pl.BlockSpec((block_batch, num_layers, k, n), lambda b: (b, 0, 0, 0)),
                pl.BlockSpec((block_batch, n), lambda b: (b, 0)),
                pl.BlockSpec((1, n), lambda b: (0, 0)),
                pl.BlockSpec((1, n), lambda b: (0, 0)),
            ],
            out_specs=pl.BlockSpec((block_batch, n), lambda b: (b, 0)),
        ),
        compiler_params=pltpu.CompilerParams(
            dimension_semantics=("parallel",),
            vmem_limit_bytes=vmem_limit,
        ),
        cost_estimate=cost,
    )(wd, x_flat, gamma2, beta2)

    return out_flat[:batch_size].reshape(batch_size, k, S)


def reference_forward(weights, x, gamma, beta, *, num_layers, k, num_samples, activation=0):
    """Pure-JAX reference mirroring the PyTorch forward (for sanity check)."""
    batch_size = weights.shape[0]
    if x.ndim == 2:
        x = jnp.broadcast_to(x[None, :, :], (batch_size, k, num_samples))
    w4 = weights.reshape(batch_size, num_layers, k, k)
    for i in range(num_layers):
        t = jnp.einsum("bij,bjs->bis", w4[:, i], x)
        mu = jnp.mean(t, axis=(1, 2), keepdims=True)
        var = jnp.mean((t - mu) ** 2, axis=(1, 2), keepdims=True)
        t = (t - mu) / jnp.sqrt(var + _LN_EPS) * gamma[None] + beta[None]
        if i % 2 == 0:
            t = _apply_activation(t, activation)
        x = x + t if i > 0 else t
    return x


if __name__ == "__main__":
    # Shapes implied by the forward: k=8, num_samples=16 (k*S = 128 lanes), num_layers=3.
    num_layers = 3
    k = 8
    num_samples = 16

    key = jax.random.PRNGKey(0)
    k_w1, k_x1, k_w2, k_x2, k_w3, k_x3 = jax.random.split(key, 6)

    # nn.LayerNorm([k, num_samples]) default init: weight=ones, bias=zeros
    gamma = jnp.ones((k, num_samples), dtype=jnp.float32)
    beta = jnp.zeros((k, num_samples), dtype=jnp.float32)

    def check(weights, x, tag, **kw):
        out = dynamic_nn_nas_forward(weights, x, gamma, beta, num_layers=num_layers,
                                     k=k, num_samples=num_samples, **kw)
        out = jax.block_until_ready(out)
        ref = reference_forward(weights, x, gamma, beta, num_layers=num_layers,
                                k=k, num_samples=num_samples)
        assert out.shape == ref.shape, f"shape mismatch ({tag})"
        assert jnp.allclose(out, ref, atol=1e-4, rtol=1e-4), f"mismatch vs reference ({tag})"

    # Case 1: batch=2, shared 2-D x (PyTorch repeat path), single grid step.
    b1 = 2
    w1 = jax.random.normal(k_w1, (b1, num_layers * k * k), dtype=jnp.float32) * 0.1
    x1 = jax.random.normal(k_x1, (k, num_samples), dtype=jnp.float32)
    check(w1, x1, "B=2 shared x")

    # Case 2: batch=4, per-batch 3-D x, single grid step.
    b2 = 4
    w2 = jax.random.normal(k_w2, (b2, num_layers * k * k), dtype=jnp.float32) * 0.1
    x2 = jax.random.normal(k_x2, (b2, k, num_samples), dtype=jnp.float32)
    check(w2, x2, "B=4 per-batch x")

    # Case 3: batch=20 with an artificially small per-block budget to exercise the
    # multi-block grid + sublane-aligned blocks + batch-padding path.
    b3 = 20
    w3 = jax.random.normal(k_w3, (b3, num_layers * k * k), dtype=jnp.float32) * 0.1
    x3 = jax.random.normal(k_x3, (b3, k, num_samples), dtype=jnp.float32)
    check(w3, x3, "B=20 multi-block", max_block_io_bytes=120_000)

    print("KERNEL_OK")
</pallas_src>

<mosaic_0001>
module attributes {stable_mosaic.version = 11 : i64} {
  func.func @_nas_kernel(%arg0: i32, %arg1: memref<2x3x8x128xf32, #tpu.memory_space<vmem>>, %arg2: memref<2x128xf32, #tpu.memory_space<vmem>>, %arg3: memref<1x128xf32, #tpu.memory_space<vmem>>, %arg4: memref<1x128xf32, #tpu.memory_space<vmem>>, %arg5: memref<2x128xf32, #tpu.memory_space<vmem>>) attributes {dimension_semantics = [#tpu.dimension_semantics<parallel>], iteration_bounds = array<i64: 1>, scalar_prefetch = 0 : i64, scratch_operands = 0 : i64, tpu.core_type = #tpu.core_type<tc>, window_params = [{transform_indices = @transform_0, window_bounds = array<i64: 2, 3, 8, 128>}, {transform_indices = @transform_1, window_bounds = array<i64: 2, 128>}, {pipeline_mode = #tpu.pipeline_mode<synchronous>, transform_indices = @transform_2, window_bounds = array<i64: 1, 128>}, {pipeline_mode = #tpu.pipeline_mode<synchronous>, transform_indices = @transform_3, window_bounds = array<i64: 1, 128>}, {transform_indices = @transform_4, window_bounds = array<i64: 2, 128>}]} {
    %c0 = arith.constant 0 : index
    %c0_0 = arith.constant 0 : index
    %0 = vector.load %arg2[%c0, %c0_0] : memref<2x128xf32, #tpu.memory_space<vmem>>, vector<2x128xf32>
    %c0_1 = arith.constant 0 : index
    %c0_2 = arith.constant 0 : index
    %1 = vector.load %arg3[%c0_1, %c0_2] : memref<1x128xf32, #tpu.memory_space<vmem>>, vector<1x128xf32>
    %c0_3 = arith.constant 0 : index
    %c0_4 = arith.constant 0 : index
    %2 = vector.load %arg4[%c0_3, %c0_4] : memref<1x128xf32, #tpu.memory_space<vmem>>, vector<1x128xf32>
    %c0_5 = arith.constant 0 : index
    %c0_6 = arith.constant 0 : index
    %c0_7 = arith.constant 0 : index
    %c0_8 = arith.constant 0 : index
    %3 = vector.load %arg1[%c0_5, %c0_6, %c0_7, %c0_8] : memref<2x3x8x128xf32, #tpu.memory_space<vmem>>, vector<2x1x1x128xf32>
    %4 = vector.shape_cast %3 : vector<2x1x1x128xf32> to vector<2x128xf32>
    %5 = arith.mulf %0, %4 : vector<2x128xf32>
    %c0_9 = arith.constant 0 : index
    %c0_10 = arith.constant 0 : index
    %c1 = arith.constant 1 : index
    %c0_11 = arith.constant 0 : index
    %6 = vector.load %arg1[%c0_9, %c0_10, %c1, %c0_11] : memref<2x3x8x128xf32, #tpu.memory_space<vmem>>, vector<2x1x1x128xf32>
    %7 = vector.shape_cast %6 : vector<2x1x1x128xf32> to vector<2x128xf32>
    %8 = vector.extract_strided_slice %0 {offsets = [0, 112], sizes = [2, 16], strides = [1, 1]} : vector<2x128xf32> to vector<2x16xf32>
    %9 = vector.extract_strided_slice %0 {offsets = [0, 0], sizes = [2, 112], strides = [1, 1]} : vector<2x128xf32> to vector<2x112xf32>
    %10 = tpu.concatenate %8, %9 in 1 : vector<2x16xf32>, vector<2x112xf32> -> vector<2x128xf32>
    %11 = arith.mulf %10, %7 : vector<2x128xf32>
    %12 = arith.addf %5, %11 : vector<2x128xf32>
    %c0_12 = arith.constant 0 : index
    %c0_13 = arith.constant 0 : index
    %c2 = arith.constant 2 : index
    %c0_14 = arith.constant 0 : index
    %13 = vector.load %arg1[%c0_12, %c0_13, %c2, %c0_14] : memref<2x3x8x128xf32, #tpu.memory_space<vmem>>, vector<2x1x1x128xf32>
    %14 = vector.shape_cast %13 : vector<2x1x1x128xf32> to vector<2x128xf32>
    %15 = vector.extract_strided_slice %0 {offsets = [0, 96], sizes = [2, 32], strides = [1, 1]} : vector<2x128xf32> to vector<2x32xf32>
    %16 = vector.extract_strided_slice %0 {offsets = [0, 0], sizes = [2, 96], strides = [1, 1]} : vector<2x128xf32> to vector<2x96xf32>
    %17 = tpu.concatenate %15, %16 in 1 : vector<2x32xf32>, vector<2x96xf32> -> vector<2x128xf32>
    %18 = arith.mulf %17, %14 : vector<2x128xf32>
    %19 = arith.addf %12, %18 : vector<2x128xf32>
    %c0_15 = arith.constant 0 : index
    %c0_16 = arith.constant 0 : index
    %c3 = arith.constant 3 : index
    %c0_17 = arith.constant 0 : index
    %20 = vector.load %arg1[%c0_15, %c0_16, %c3, %c0_17] : memref<2x3x8x128xf32, #tpu.memory_space<vmem>>, vector<2x1x1x128xf32>
    %21 = vector.shape_cast %20 : vector<2x1x1x128xf32> to vector<2x128xf32>
    %22 = vector.extract_strided_slice %0 {offsets = [0, 80], sizes = [2, 48], strides = [1, 1]} : vector<2x128xf32> to vector<2x48xf32>
    %23 = vector.extract_strided_slice %0 {offsets = [0, 0], sizes = [2, 80], strides = [1, 1]} : vector<2x128xf32> to vector<2x80xf32>
    %24 = tpu.concatenate %22, %23 in 1 : vector<2x48xf32>, vector<2x80xf32> -> vector<2x128xf32>
    %25 = arith.mulf %24, %21 : vector<2x128xf32>
    %26 = arith.addf %19, %25 : vector<2x128xf32>
    %c0_18 = arith.constant 0 : index
    %c0_19 = arith.constant 0 : index
    %c4 = arith.constant 4 : index
    %c0_20 = arith.constant 0 : index
    %27 = vector.load %arg1[%c0_18, %c0_19, %c4, %c0_20] : memref<2x3x8x128xf32, #tpu.memory_space<vmem>>, vector<2x1x1x128xf32>
    %28 = vector.shape_cast %27 : vector<2x1x1x128xf32> to vector<2x128xf32>
    %29 = vector.extract_strided_slice %0 {offsets = [0, 64], sizes = [2, 64], strides = [1, 1]} : vector<2x128xf32> to vector<2x64xf32>
    %30 = vector.extract_strided_slice %0 {offsets = [0, 0], sizes = [2, 64], strides = [1, 1]} : vector<2x128xf32> to vector<2x64xf32>
    %31 = tpu.concatenate %29, %30 in 1 : vector<2x64xf32>, vector<2x64xf32> -> vector<2x128xf32>
    %32 = arith.mulf %31, %28 : vector<2x128xf32>
    %33 = arith.addf %26, %32 : vector<2x128xf32>
    %c0_21 = arith.constant 0 : index
    %c0_22 = arith.constant 0 : index
    %c5 = arith.constant 5 : index
    %c0_23 = arith.constant 0 : index
    %34 = vector.load %arg1[%c0_21, %c0_22, %c5, %c0_23] : memref<2x3x8x128xf32, #tpu.memory_space<vmem>>, vector<2x1x1x128xf32>
    %35 = vector.shape_cast %34 : vector<2x1x1x128xf32> to vector<2x128xf32>
    %36 = vector.extract_strided_slice %0 {offsets = [0, 48], sizes = [2, 80], strides = [1, 1]} : vector<2x128xf32> to vector<2x80xf32>
    %37 = vector.extract_strided_slice %0 {offsets = [0, 0], sizes = [2, 48], strides = [1, 1]} : vector<2x128xf32> to vector<2x48xf32>
    %38 = tpu.concatenate %36, %37 in 1 : vector<2x80xf32>, vector<2x48xf32> -> vector<2x128xf32>
    %39 = arith.mulf %38, %35 : vector<2x128xf32>
    %40 = arith.addf %33, %39 : vector<2x128xf32>
    %c0_24 = arith.constant 0 : index
    %c0_25 = arith.constant 0 : index
    %c6 = arith.constant 6 : index
    %c0_26 = arith.constant 0 : index
    %41 = vector.load %arg1[%c0_24, %c0_25, %c6, %c0_26] : memref<2x3x8x128xf32, #tpu.memory_space<vmem>>, vector<2x1x1x128xf32>
    %42 = vector.shape_cast %41 : vector<2x1x1x128xf32> to vector<2x128xf32>
    %43 = vector.extract_strided_slice %0 {offsets = [0, 32], sizes = [2, 96], strides = [1, 1]} : vector<2x128xf32> to vector<2x96xf32>
    %44 = vector.extract_strided_slice %0 {offsets = [0, 0], sizes = [2, 32], strides = [1, 1]} : vector<2x128xf32> to vector<2x32xf32>
    %45 = tpu.concatenate %43, %44 in 1 : vector<2x96xf32>, vector<2x32xf32> -> vector<2x128xf32>
    %46 = arith.mulf %45, %42 : vector<2x128xf32>
    %47 = arith.addf %40, %46 : vector<2x128xf32>
    %c0_27 = arith.constant 0 : index
    %c0_28 = arith.constant 0 : index
    %c7 = arith.constant 7 : index
    %c0_29 = arith.constant 0 : index
    %48 = vector.load %arg1[%c0_27, %c0_28, %c7, %c0_29] : memref<2x3x8x128xf32, #tpu.memory_space<vmem>>, vector<2x1x1x128xf32>
    %49 = vector.shape_cast %48 : vector<2x1x1x128xf32> to vector<2x128xf32>
    %50 = vector.extract_strided_slice %0 {offsets = [0, 16], sizes = [2, 112], strides = [1, 1]} : vector<2x128xf32> to vector<2x112xf32>
    %51 = vector.extract_strided_slice %0 {offsets = [0, 0], sizes = [2, 16], strides = [1, 1]} : vector<2x128xf32> to vector<2x16xf32>
    %52 = tpu.concatenate %50, %51 in 1 : vector<2x112xf32>, vector<2x16xf32> -> vector<2x128xf32>
    %53 = arith.mulf %52, %49 : vector<2x128xf32>
    %54 = arith.addf %47, %53 : vector<2x128xf32>
    %cst = arith.constant dense<0.000000e+00> : vector<2xf32>
    %55 = vector.multi_reduction <add>, %54, %cst [1] : vector<2x128xf32> to vector<2xf32>
    %56 = vector.shape_cast %55 : vector<2xf32> to vector<2x1xf32>
    %cst_30 = arith.constant 7.812500e-03 : f32
    %57 = vector.broadcast %cst_30 : f32 to vector<2x1xf32>
    %58 = arith.mulf %56, %57 : vector<2x1xf32>
    %59 = vector.broadcast %58 : vector<2x1xf32> to vector<2x128xf32>
    %60 = arith.subf %54, %59 : vector<2x128xf32>
    %61 = arith.mulf %60, %60 : vector<2x128xf32>
    %cst_31 = arith.constant dense<0.000000e+00> : vector<2xf32>
    %62 = vector.multi_reduction <add>, %61, %cst_31 [1] : vector<2x128xf32> to vector<2xf32>
    %63 = vector.shape_cast %62 : vector<2xf32> to vector<2x1xf32>
    %cst_32 = arith.constant 7.812500e-03 : f32
    %64 = vector.broadcast %cst_32 : f32 to vector<2x1xf32>
    %65 = arith.mulf %63, %64 : vector<2x1xf32>
    %cst_33 = arith.constant 9.99999974E-6 : f32
    %66 = vector.broadcast %cst_33 : f32 to vector<2x1xf32>
    %67 = arith.addf %65, %66 : vector<2x1xf32>
    %68 = math.rsqrt %67 : vector<2x1xf32>
    %69 = vector.broadcast %68 : vector<2x1xf32> to vector<2x128xf32>
    %70 = arith.mulf %60, %69 : vector<2x128xf32>
    %71 = vector.broadcast %1 : vector<1x128xf32> to vector<2x128xf32>
    %72 = arith.mulf %70, %71 : vector<2x128xf32>
    %73 = vector.broadcast %2 : vector<1x128xf32> to vector<2x128xf32>
    %74 = arith.addf %72, %73 : vector<2x128xf32>
    %cst_34 = arith.constant 0.000000e+00 : f32
    %75 = vector.broadcast %cst_34 : f32 to vector<2x128xf32>
    %76 = arith.maximumf %74, %75 : vector<2x128xf32>
    %c0_35 = arith.constant 0 : index
    %c1_36 = arith.constant 1 : index
    %c0_37 = arith.constant 0 : index
    %c0_38 = arith.constant 0 : index
    %77 = vector.load %arg1[%c0_35, %c1_36, %c0_37, %c0_38] : memref<2x3x8x128xf32, #tpu.memory_space<vmem>>, vector<2x1x1x128xf32>
    %78 = vector.shape_cast %77 : vector<2x1x1x128xf32> to vector<2x128xf32>
    %79 = arith.mulf %76, %78 : vector<2x128xf32>
    %c0_39 = arith.constant 0 : index
    %c1_40 = arith.constant 1 : index
    %c1_41 = arith.constant 1 : index
    %c0_42 = arith.constant 0 : index
    %80 = vector.load %arg1[%c0_39, %c1_40, %c1_41, %c0_42] : memref<2x3x8x128xf32, #tpu.memory_space<vmem>>, vector<2x1x1x128xf32>
    %81 = vector.shape_cast %80 : vector<2x1x1x128xf32> to vector<2x128xf32>
    %82 = vector.extract_strided_slice %76 {offsets = [0, 112], sizes = [2, 16], strides = [1, 1]} : vector<2x128xf32> to vector<2x16xf32>
    %83 = vector.extract_strided_slice %76 {offsets = [0, 0], sizes = [2, 112], strides = [1, 1]} : vector<2x128xf32> to vector<2x112xf32>
    %84 = tpu.concatenate %82, %83 in 1 : vector<2x16xf32>, vector<2x112xf32> -> vector<2x128xf32>
    %85 = arith.mulf %84, %81 : vector<2x128xf32>
    %86 = arith.addf %79, %85 : vector<2x128xf32>
    %c0_43 = arith.constant 0 : index
    %c1_44 = arith.constant 1 : index
    %c2_45 = arith.constant 2 : index
    %c0_46 = arith.constant 0 : index
    %87 = vector.load %arg1[%c0_43, %c1_44, %c2_45, %c0_46] : memref<2x3x8x128xf32, #tpu.memory_space<vmem>>, vector<2x1x1x128xf32>
    %88 = vector.shape_cast %87 : vector<2x1x1x128xf32> to vector<2x128xf32>
    %89 = vector.extract_strided_slice %76 {offsets = [0, 96], sizes = [2, 32], strides = [1, 1]} : vector<2x128xf32> to vector<2x32xf32>
    %90 = vector.extract_strided_slice %76 {offsets = [0, 0], sizes = [2, 96], strides = [1, 1]} : vector<2x128xf32> to vector<2x96xf32>
    %91 = tpu.concatenate %89, %90 in 1 : vector<2x32xf32>, vector<2x96xf32> -> vector<2x128xf32>
    %92 = arith.mulf %91, %88 : vector<2x128xf32>
    %93 = arith.addf %86, %92 : vector<2x128xf32>
    %c0_47 = arith.constant 0 : index
    %c1_48 = arith.constant 1 : index
    %c3_49 = arith.constant 3 : index
    %c0_50 = arith.constant 0 : index
    %94 = vector.load %arg1[%c0_47, %c1_48, %c3_49, %c0_50] : memref<2x3x8x128xf32, #tpu.memory_space<vmem>>, vector<2x1x1x128xf32>
    %95 = vector.shape_cast %94 : vector<2x1x1x128xf32> to vector<2x128xf32>
    %96 = vector.extract_strided_slice %76 {offsets = [0, 80], sizes = [2, 48], strides = [1, 1]} : vector<2x128xf32> to vector<2x48xf32>
    %97 = vector.extract_strided_slice %76 {offsets = [0, 0], sizes = [2, 80], strides = [1, 1]} : vector<2x128xf32> to vector<2x80xf32>
    %98 = tpu.concatenate %96, %97 in 1 : vector<2x48xf32>, vector<2x80xf32> -> vector<2x128xf32>
    %99 = arith.mulf %98, %95 : vector<2x128xf32>
    %100 = arith.addf %93, %99 : vector<2x128xf32>
    %c0_51 = arith.constant 0 : index
    %c1_52 = arith.constant 1 : index
    %c4_53 = arith.constant 4 : index
    %c0_54 = arith.constant 0 : index
    %101 = vector.load %arg1[%c0_51, %c1_52, %c4_53, %c0_54] : memref<2x3x8x128xf32, #tpu.memory_space<vmem>>, vector<2x1x1x128xf32>
    %102 = vector.shape_cast %101 : vector<2x1x1x128xf32> to vector<2x128xf32>
    %103 = vector.extract_strided_slice %76 {offsets = [0, 64], sizes = [2, 64], strides = [1, 1]} : vector<2x128xf32> to vector<2x64xf32>
    %104 = vector.extract_strided_slice %76 {offsets = [0, 0], sizes = [2, 64], strides = [1, 1]} : vector<2x128xf32> to vector<2x64xf32>
    %105 = tpu.concatenate %103, %104 in 1 : vector<2x64xf32>, vector<2x64xf32> -> vector<2x128xf32>
    %106 = arith.mulf %105, %102 : vector<2x128xf32>
    %107 = arith.addf %100, %106 : vector<2x128xf32>
    %c0_55 = arith.constant 0 : index
    %c1_56 = arith.constant 1 : index
    %c5_57 = arith.constant 5 : index
    %c0_58 = arith.constant 0 : index
    %108 = vector.load %arg1[%c0_55, %c1_56, %c5_57, %c0_58] : memref<2x3x8x128xf32, #tpu.memory_space<vmem>>, vector<2x1x1x128xf32>
    %109 = vector.shape_cast %108 : vector<2x1x1x128xf32> to vector<2x128xf32>
    %110 = vector.extract_strided_slice %76 {offsets = [0, 48], sizes = [2, 80], strides = [1, 1]} : vector<2x128xf32> to vector<2x80xf32>
    %111 = vector.extract_strided_slice %76 {offsets = [0, 0], sizes = [2, 48], strides = [1, 1]} : vector<2x128xf32> to vector<2x48xf32>
    %112 = tpu.concatenate %110, %111 in 1 : vector<2x80xf32>, vector<2x48xf32> -> vector<2x128xf32>
    %113 = arith.mulf %112, %109 : vector<2x128xf32>
    %114 = arith.addf %107, %113 : vector<2x128xf32>
    %c0_59 = arith.constant 0 : index
    %c1_60 = arith.constant 1 : index
    %c6_61 = arith.constant 6 : index
    %c0_62 = arith.constant 0 : index
    %115 = vector.load %arg1[%c0_59, %c1_60, %c6_61, %c0_62] : memref<2x3x8x128xf32, #tpu.memory_space<vmem>>, vector<2x1x1x128xf32>
    %116 = vector.shape_cast %115 : vector<2x1x1x128xf32> to vector<2x128xf32>
    %117 = vector.extract_strided_slice %76 {offsets = [0, 32], sizes = [2, 96], strides = [1, 1]} : vector<2x128xf32> to vector<2x96xf32>
    %118 = vector.extract_strided_slice %76 {offsets = [0, 0], sizes = [2, 32], strides = [1, 1]} : vector<2x128xf32> to vector<2x32xf32>
    %119 = tpu.concatenate %117, %118 in 1 : vector<2x96xf32>, vector<2x32xf32> -> vector<2x128xf32>
    %120 = arith.mulf %119, %116 : vector<2x128xf32>
    %121 = arith.addf %114, %120 : vector<2x128xf32>
    %c0_63 = arith.constant 0 : index
    %c1_64 = arith.constant 1 : index
    %c7_65 = arith.constant 7 : index
    %c0_66 = arith.constant 0 : index
    %122 = vector.load %arg1[%c0_63, %c1_64, %c7_65, %c0_66] : memref<2x3x8x128xf32, #tpu.memory_space<vmem>>, vector<2x1x1x128xf32>
    %123 = vector.shape_cast %122 : vector<2x1x1x128xf32> to vector<2x128xf32>
    %124 = vector.extract_strided_slice %76 {offsets = [0, 16], sizes = [2, 112], strides = [1, 1]} : vector<2x128xf32> to vector<2x112xf32>
    %125 = vector.extract_strided_slice %76 {offsets = [0, 0], sizes = [2, 16], strides = [1, 1]} : vector<2x128xf32> to vector<2x16xf32>
    %126 = tpu.concatenate %124, %125 in 1 : vector<2x112xf32>, vector<2x16xf32> -> vector<2x128xf32>
    %127 = arith.mulf %126, %123 : vector<2x128xf32>
    %128 = arith.addf %121, %127 : vector<2x128xf32>
    %cst_67 = arith.constant dense<0.000000e+00> : vector<2xf32>
    %129 = vector.multi_reduction <add>, %128, %cst_67 [1] : vector<2x128xf32> to vector<2xf32>
    %130 = vector.shape_cast %129 : vector<2xf32> to vector<2x1xf32>
    %cst_68 = arith.constant 7.812500e-03 : f32
    %131 = vector.broadcast %cst_68 : f32 to vector<2x1xf32>
    %132 = arith.mulf %130, %131 : vector<2x1xf32>
    %133 = vector.broadcast %132 : vector<2x1xf32> to vector<2x128xf32>
    %134 = arith.subf %128, %133 : vector<2x128xf32>
    %135 = arith.mulf %134, %134 : vector<2x128xf32>
    %cst_69 = arith.constant dense<0.000000e+00> : vector<2xf32>
    %136 = vector.multi_reduction <add>, %135, %cst_69 [1] : vector<2x128xf32> to vector<2xf32>
    %137 = vector.shape_cast %136 : vector<2xf32> to vector<2x1xf32>
    %cst_70 = arith.constant 7.812500e-03 : f32
    %138 = vector.broadcast %cst_70 : f32 to vector<2x1xf32>
    %139 = arith.mulf %137, %138 : vector<2x1xf32>
    %cst_71 = arith.constant 9.99999974E-6 : f32
    %140 = vector.broadcast %cst_71 : f32 to vector<2x1xf32>
    %141 = arith.addf %139, %140 : vector<2x1xf32>
    %142 = math.rsqrt %141 : vector<2x1xf32>
    %143 = vector.broadcast %142 : vector<2x1xf32> to vector<2x128xf32>
    %144 = arith.mulf %134, %143 : vector<2x128xf32>
    %145 = vector.broadcast %1 : vector<1x128xf32> to vector<2x128xf32>
    %146 = arith.mulf %144, %145 : vector<2x128xf32>
    %147 = vector.broadcast %2 : vector<1x128xf32> to vector<2x128xf32>
    %148 = arith.addf %146, %147 : vector<2x128xf32>
    %149 = arith.addf %76, %148 : vector<2x128xf32>
    %c0_72 = arith.constant 0 : index
    %c2_73 = arith.constant 2 : index
    %c0_74 = arith.constant 0 : index
    %c0_75 = arith.constant 0 : index
    %150 = vector.load %arg1[%c0_72, %c2_73, %c0_74, %c0_75] : memref<2x3x8x128xf32, #tpu.memory_space<vmem>>, vector<2x1x1x128xf32>
    %151 = vector.shape_cast %150 : vector<2x1x1x128xf32> to vector<2x128xf32>
    %152 = arith.mulf %149, %151 : vector<2x128xf32>
    %c0_76 = arith.constant 0 : index
    %c2_77 = arith.constant 2 : index
    %c1_78 = arith.constant 1 : index
    %c0_79 = arith.constant 0 : index
    %153 = vector.load %arg1[%c0_76, %c2_77, %c1_78, %c0_79] : memref<2x3x8x128xf32, #tpu.memory_space<vmem>>, vector<2x1x1x128xf32>
    %154 = vector.shape_cast %153 : vector<2x1x1x128xf32> to vector<2x128xf32>
    %155 = vector.extract_strided_slice %149 {offsets = [0, 112], sizes = [2, 16], strides = [1, 1]} : vector<2x128xf32> to vector<2x16xf32>
    %156 = vector.extract_strided_slice %149 {offsets = [0, 0], sizes = [2, 112], strides = [1, 1]} : vector<2x128xf32> to vector<2x112xf32>
    %157 = tpu.concatenate %155, %156 in 1 : vector<2x16xf32>, vector<2x112xf32> -> vector<2x128xf32>
    %158 = arith.mulf %157, %154 : vector<2x128xf32>
    %159 = arith.addf %152, %158 : vector<2x128xf32>
    %c0_80 = arith.constant 0 : index
    %c2_81 = arith.constant 2 : index
    %c2_82 = arith.constant 2 : index
    %c0_83 = arith.constant 0 : index
    %160 = vector.load %arg1[%c0_80, %c2_81, %c2_82, %c0_83] : memref<2x3x8x128xf32, #tpu.memory_space<vmem>>, vector<2x1x1x128xf32>
    %161 = vector.shape_cast %160 : vector<2x1x1x128xf32> to vector<2x128xf32>
    %162 = vector.extract_strided_slice %149 {offsets = [0, 96], sizes = [2, 32], strides = [1, 1]} : vector<2x128xf32> to vector<2x32xf32>
    %163 = vector.extract_strided_slice %149 {offsets = [0, 0], sizes = [2, 96], strides = [1, 1]} : vector<2x128xf32> to vector<2x96xf32>
    %164 = tpu.concatenate %162, %163 in 1 : vector<2x32xf32>, vector<2x96xf32> -> vector<2x128xf32>
    %165 = arith.mulf %164, %161 : vector<2x128xf32>
    %166 = arith.addf %159, %165 : vector<2x128xf32>
    %c0_84 = arith.constant 0 : index
    %c2_85 = arith.constant 2 : index
    %c3_86 = arith.constant 3 : index
    %c0_87 = arith.constant 0 : index
    %167 = vector.load %arg1[%c0_84, %c2_85, %c3_86, %c0_87] : memref<2x3x8x128xf32, #tpu.memory_space<vmem>>, vector<2x1x1x128xf32>
    %168 = vector.shape_cast %167 : vector<2x1x1x128xf32> to vector<2x128xf32>
    %169 = vector.extract_strided_slice %149 {offsets = [0, 80], sizes = [2, 48], strides = [1, 1]} : vector<2x128xf32> to vector<2x48xf32>
    %170 = vector.extract_strided_slice %149 {offsets = [0, 0], sizes = [2, 80], strides = [1, 1]} : vector<2x128xf32> to vector<2x80xf32>
    %171 = tpu.concatenate %169, %170 in 1 : vector<2x48xf32>, vector<2x80xf32> -> vector<2x128xf32>
    %172 = arith.mulf %171, %168 : vector<2x128xf32>
    %173 = arith.addf %166, %172 : vector<2x128xf32>
    %c0_88 = arith.constant 0 : index
    %c2_89 = arith.constant 2 : index
    %c4_90 = arith.constant 4 : index
    %c0_91 = arith.constant 0 : index
    %174 = vector.load %arg1[%c0_88, %c2_89, %c4_90, %c0_91] : memref<2x3x8x128xf32, #tpu.memory_space<vmem>>, vector<2x1x1x128xf32>
    %175 = vector.shape_cast %174 : vector<2x1x1x128xf32> to vector<2x128xf32>
    %176 = vector.extract_strided_slice %149 {offsets = [0, 64], sizes = [2, 64], strides = [1, 1]} : vector<2x128xf32> to vector<2x64xf32>
    %177 = vector.extract_strided_slice %149 {offsets = [0, 0], sizes = [2, 64], strides = [1, 1]} : vector<2x128xf32> to vector<2x64xf32>
    %178 = tpu.concatenate %176, %177 in 1 : vector<2x64xf32>, vector<2x64xf32> -> vector<2x128xf32>
    %179 = arith.mulf %178, %175 : vector<2x128xf32>
    %180 = arith.addf %173, %179 : vector<2x128xf32>
    %c0_92 = arith.constant 0 : index
    %c2_93 = arith.constant 2 : index
    %c5_94 = arith.constant 5 : index
    %c0_95 = arith.constant 0 : index
    %181 = vector.load %arg1[%c0_92, %c2_93, %c5_94, %c0_95] : memref<2x3x8x128xf32, #tpu.memory_space<vmem>>, vector<2x1x1x128xf32>
    %182 = vector.shape_cast %181 : vector<2x1x1x128xf32> to vector<2x128xf32>
    %183 = vector.extract_strided_slice %149 {offsets = [0, 48], sizes = [2, 80], strides = [1, 1]} : vector<2x128xf32> to vector<2x80xf32>
    %184 = vector.extract_strided_slice %149 {offsets = [0, 0], sizes = [2, 48], strides = [1, 1]} : vector<2x128xf32> to vector<2x48xf32>
    %185 = tpu.concatenate %183, %184 in 1 : vector<2x80xf32>, vector<2x48xf32> -> vector<2x128xf32>
    %186 = arith.mulf %185, %182 : vector<2x128xf32>
    %187 = arith.addf %180, %186 : vector<2x128xf32>
    %c0_96 = arith.constant 0 : index
    %c2_97 = arith.constant 2 : index
    %c6_98 = arith.constant 6 : index
    %c0_99 = arith.constant 0 : index
    %188 = vector.load %arg1[%c0_96, %c2_97, %c6_98, %c0_99] : memref<2x3x8x128xf32, #tpu.memory_space<vmem>>, vector<2x1x1x128xf32>
    %189 = vector.shape_cast %188 : vector<2x1x1x128xf32> to vector<2x128xf32>
    %190 = vector.extract_strided_slice %149 {offsets = [0, 32], sizes = [2, 96], strides = [1, 1]} : vector<2x128xf32> to vector<2x96xf32>
    %191 = vector.extract_strided_slice %149 {offsets = [0, 0], sizes = [2, 32], strides = [1, 1]} : vector<2x128xf32> to vector<2x32xf32>
    %192 = tpu.concatenate %190, %191 in 1 : vector<2x96xf32>, vector<2x32xf32> -> vector<2x128xf32>
    %193 = arith.mulf %192, %189 : vector<2x128xf32>
    %194 = arith.addf %187, %193 : vector<2x128xf32>
    %c0_100 = arith.constant 0 : index
    %c2_101 = arith.constant 2 : index
    %c7_102 = arith.constant 7 : index
    %c0_103 = arith.constant 0 : index
    %195 = vector.load %arg1[%c0_100, %c2_101, %c7_102, %c0_103] : memref<2x3x8x128xf32, #tpu.memory_space<vmem>>, vector<2x1x1x128xf32>
    %196 = vector.shape_cast %195 : vector<2x1x1x128xf32> to vector<2x128xf32>
    %197 = vector.extract_strided_slice %149 {offsets = [0, 16], sizes = [2, 112], strides = [1, 1]} : vector<2x128xf32> to vector<2x112xf32>
    %198 = vector.extract_strided_slice %149 {offsets = [0, 0], sizes = [2, 16], strides = [1, 1]} : vector<2x128xf32> to vector<2x16xf32>
    %199 = tpu.concatenate %197, %198 in 1 : vector<2x112xf32>, vector<2x16xf32> -> vector<2x128xf32>
    %200 = arith.mulf %199, %196 : vector<2x128xf32>
    %201 = arith.addf %194, %200 : vector<2x128xf32>
    %cst_104 = arith.constant dense<0.000000e+00> : vector<2xf32>
    %202 = vector.multi_reduction <add>, %201, %cst_104 [1] : vector<2x128xf32> to vector<2xf32>
    %203 = vector.shape_cast %202 : vector<2xf32> to vector<2x1xf32>
    %cst_105 = arith.constant 7.812500e-03 : f32
    %204 = vector.broadcast %cst_105 : f32 to vector<2x1xf32>
    %205 = arith.mulf %203, %204 : vector<2x1xf32>
    %206 = vector.broadcast %205 : vector<2x1xf32> to vector<2x128xf32>
    %207 = arith.subf %201, %206 : vector<2x128xf32>
    %208 = arith.mulf %207, %207 : vector<2x128xf32>
    %cst_106 = arith.constant dense<0.000000e+00> : vector<2xf32>
    %209 = vector.multi_reduction <add>, %208, %cst_106 [1] : vector<2x128xf32> to vector<2xf32>
    %210 = vector.shape_cast %209 : vector<2xf32> to vector<2x1xf32>
    %cst_107 = arith.constant 7.812500e-03 : f32
    %211 = vector.broadcast %cst_107 : f32 to vector<2x1xf32>
    %212 = arith.mulf %210, %211 : vector<2x1xf32>
    %cst_108 = arith.constant 9.99999974E-6 : f32
    %213 = vector.broadcast %cst_108 : f32 to vector<2x1xf32>
    %214 = arith.addf %212, %213 : vector<2x1xf32>
    %215 = math.rsqrt %214 : vector<2x1xf32>
    %216 = vector.broadcast %215 : vector<2x1xf32> to vector<2x128xf32>
    %217 = arith.mulf %207, %216 : vector<2x128xf32>
    %218 = vector.broadcast %1 : vector<1x128xf32> to vector<2x128xf32>
    %219 = arith.mulf %217, %218 : vector<2x128xf32>
    %220 = vector.broadcast %2 : vector<1x128xf32> to vector<2x128xf32>
    %221 = arith.addf %219, %220 : vector<2x128xf32>
    %cst_109 = arith.constant 0.000000e+00 : f32
    %222 = vector.broadcast %cst_109 : f32 to vector<2x128xf32>
    %223 = arith.maximumf %221, %222 : vector<2x128xf32>
    %224 = arith.addf %149, %223 : vector<2x128xf32>
    %c0_110 = arith.constant 0 : index
    %c0_111 = arith.constant 0 : index
    %225 = vector.load %arg5[%c0_110, %c0_111] : memref<2x128xf32, #tpu.memory_space<vmem>>, vector<2x128xf32>
    tpu.vector_store %arg5[%c0_110, %c0_111], %224 {strides = array<i32>} : memref<2x128xf32, #tpu.memory_space<vmem>>, vector<2x128xf32>,
    return
  }
  func.func @transform_0(%arg0: i32) -> (i32, i32, i32, i32) {
    %c0_i32 = arith.constant 0 : i32
    %c0_i32_0 = arith.constant 0 : i32
    %c0_i32_1 = arith.constant 0 : i32
    %c0_i32_2 = arith.constant 0 : i32
    return %arg0, %c0_i32, %c0_i32_0, %c0_i32_1 : i32, i32, i32, i32
  }
  func.func @transform_1(%arg0: i32) -> (i32, i32) {
    %c0_i32 = arith.constant 0 : i32
    %c0_i32_0 = arith.constant 0 : i32
    return %arg0, %c0_i32 : i32, i32
  }
  func.func @transform_2(%arg0: i32) -> (i32, i32) {
    %c0_i32 = arith.constant 0 : i32
    %c0_i32_0 = arith.constant 0 : i32
    %c0_i32_1 = arith.constant 0 : i32
    return %c0_i32, %c0_i32_0 : i32, i32
  }
  func.func @transform_3(%arg0: i32) -> (i32, i32) {
    %c0_i32 = arith.constant 0 : i32
    %c0_i32_0 = arith.constant 0 : i32
    %c0_i32_1 = arith.constant 0 : i32
    return %c0_i32, %c0_i32_0 : i32, i32
  }
  func.func @transform_4(%arg0: i32) -> (i32, i32) {
    %c0_i32 = arith.constant 0 : i32
    %c0_i32_0 = arith.constant 0 : i32
    return %arg0, %c0_i32 : i32, i32
  }
}

</mosaic_0001>

<bundles_post_ra>
// kernel: tpu_custom_call.1
= control target key start
LH: loop header
LB: loop body
LE: loop exit
PB: predicated region body
PF: predicated region fallthrough
CT: control target
= control target key end

     0   :  { %9 = vsyncpa [#allocation3], 0  ;;  %s629_s0 = inlined_call_operand.hbm [shape: f32[2,3,8,128], index: 0, kind: input, shape index: {}]   ;;  %s630_s1 = inlined_call_operand.hbm [shape: f32[2,128], index: 1, kind: input, shape index: {}]   ;;  %s631_s2 = inlined_call_operand.vmem [shape: f32[1,128], index: 2, kind: input, shape index: {}]   ;;  %s632_s3 = inlined_call_operand.vmem [shape: f32[1,128], index: 3, kind: input, shape index: {}]   ;;  %s633_s4 = inlined_call_operand.hbm [shape: f32[2,128], index: 4, kind: output, shape index: {}]  }
   0x1   :  { %10 = vsyncpa [#allocation6], 0 }
   0x2   :  { %11 = vsyncpa [#allocation4], 0  ;;  %s494_s15 = smov [#allocation2]  }
   0x3   :  { %s17_s16 = sshll.u32 %s494_s15, 4  ;;  %s18_s16 = int_to_ptr.vmem [resolvable:$true] %s17_s16 }
   0x4   :  { %s436_s17 = scalar_lea.vmem %s18_s16, 768  ;;  %p441_p1 = scmp.lt.s32.totalorder %s18_s16, %s18_s16 }
   0x5   :  { %p437_p0 = scmp.ne.s32.totalorder %s18_s16, %s436_s17  ;;  %p442_p2 = scmp.lt.s32.totalorder %s436_s17, %s436_s17 }
   0x7   :  { %p443_p3 = por %p442_p2, %p441_p1 }
   0x9   :  { %p444_p4 = pnand %p443_p3, %p437_p0 }
   0xb   :  { %447 = shalt.err (!%p444_p4)
}
   0xc   :  { %s495_s18 = smov 128   ;;  %s496_s19 = smov 8  }
   0xd   :  { %23 = dma.hbm_to_vmem [thread:$0]  %s629_s0, 768, %s18_s16, [#allocation3], %s495_s18, %s495_s18, %s496_s19  }
   0xe   :  { %s497_s22 = smov [#allocation5]  }
   0xf   :  { %s30_s23 = sshll.u32 %s497_s22, 4  ;;  %s31_s23 = int_to_ptr.vmem [resolvable:$true] %s30_s23 }
  0x10   :  { %s456_s24 = scalar_lea.vmem %s31_s23, 32  ;;  %p461_p6 = scmp.lt.s32.totalorder %s31_s23, %s31_s23 }
  0x11   :  { %p457_p5 = scmp.ne.s32.totalorder %s31_s23, %s456_s24  ;;  %p462_p7 = scmp.lt.s32.totalorder %s456_s24, %s456_s24 }
  0x13   :  { %p463_p8 = por %p462_p7, %p461_p6 }
  0x15   :  { %p464_p9 = pnand %p463_p8, %p457_p5 }
  0x17   :  { %467 = shalt.err (!%p464_p9)
}
  0x18   :  { %33 = dma.hbm_to_vmem [thread:$0]  %s630_s1, 32, %s31_s23, [#allocation6]  }
  0x19   :  { %488 = dma.done.wait [#allocation3], 768  }
  0x1a   :  { %489 = vsyncadd [#allocation3], 4294966528 }
  0x1b   :  { %490 = dma.done.wait [#allocation6], 32  }
  0x1c   :  { %491 = vsyncadd [#allocation6], 4294967264  ;;  %v44_v0 = vld [vmem:[#allocation5] sm:$0x3]  ;;  %s498_s0 = smov 16   ;;  %s499_s27 = smov 48  }
  0x1d   :  { %59 = vrot.lane.b32.xlu0 %v44_v0, %s498_s0  ;;  %83 = vrot.lane.b32.xlu1 %v44_v0, %s499_s27  ;;  %s500_s28 = smov 32   ;;  %s501_s29 = smov 64   ;;  %v48_v1 = vld [vmem:[#allocation2 + $0x18] sm:$0x1]  ;;  %v57_v2 = vld [vmem:[#allocation2 + $0x19] sm:$0x1] }
  0x1e   :  { %s502_s30 = smov 80   ;;  %s503_s1 = smov 96   ;;  %v51_v3 = vrot.slane %v48_v1, 7  ;;  %vm52_vm0 = vcmask 1041409   ;;  %v64_v4 = vrot.slane %v57_v2, 7  ;;  %vm141_vm1 = vcmask 1041408  }
  0x1f   :  { %s504_s5 = smov 112   ;;  %v47_v5 = vld [vmem:[#allocation2] sm:$0x1]  ;;  %v56_v6 = vld [vmem:[#allocation2 + $0x1] sm:$0x1] }
  0x20   :  { %v70_v7 = vld [vmem:[#allocation2 + $0x1a] sm:$0x1]  ;;  %v82_v8 = vld [vmem:[#allocation2 + $0x1b] sm:$0x1]  ;;  %v94_v9 = vld [vmem:[#allocation2 + $0x1c] sm:$0x1]  ;;  %v53_v10 = vsel %vm52_vm0, %v51_v3, %v47_v5  ;;  %v65_v11 = vsel %vm52_vm0, %v64_v4, %v56_v6 }
  0x21   :  { %71 = vrot.lane.b32.xlu0 %v44_v0, %s500_s28  ;;  %95 = vrot.lane.b32.xlu1 %v44_v0, %s501_s29  ;;  %v76_v12 = vrot.slane %v70_v7, 7  ;;  %v69_v13 = vld [vmem:[#allocation2 + $0x2] sm:$0x1]  ;;  %v106_v14 = vld [vmem:[#allocation2 + $0x1d] sm:$0x1]  ;;  %v88_v16 = vrot.slane %v82_v8, 7  ;;  %v55_v19 = vmul.f32 %v53_v10, %v44_v0 }
  0x22   :  { %v100_v18 = vrot.slane %v94_v9, 7  ;;  %v81_v21 = vld [vmem:[#allocation2 + $0x3] sm:$0x1]  ;;  %v93_v22 = vld [vmem:[#allocation2 + $0x4] sm:$0x1]  ;;  %v112_v25 = vrot.slane %v106_v14, 7 }
  0x23   :  { %v118_v23 = vld [vmem:[#allocation2 + $0x1e] sm:$0x1]  ;;  %v77_v24 = vsel %vm52_vm0, %v76_v12, %v69_v13  ;;  %v105_v26 = vld [vmem:[#allocation2 + $0x5] sm:$0x1]  ;;  %v130_v27 = vld [vmem:[#allocation2 + $0x1f] sm:$0x1]  ;;  %v89_v28 = vsel %vm52_vm0, %v88_v16, %v81_v21 }
  0x24   :  { %v101_v30 = vsel %vm52_vm0, %v100_v18, %v93_v22  ;;  %v124_v32 = vrot.slane %v118_v23, 7  ;;  %v117_v35 = vld [vmem:[#allocation2 + $0x6] sm:$0x1]  ;;  %v113_v36 = vsel %vm52_vm0, %v112_v25, %v105_v26  ;;  %v136_v37 = vrot.slane %v130_v27, 7  ;;  %v129_v41 = vld [vmem:[#allocation2 + $0x7] sm:$0x1] }
  0x25   :  { %107 = vrot.lane.b32.xlu0 %v44_v0, %s502_s30  ;;  %119 = vrot.lane.b32.xlu1 %v44_v0, %s503_s1  ;;  %v557_v1 = vld [vmem:[%s631_s2] ss:$0 sm:$0xff]  ;;  %v180_v8 = vld [vmem:[#allocation2 + $0x21] sm:$0x1]  ;;  %v193_v9 = vld [vmem:[#allocation2 + $0x22] sm:$0x1] }
  0x26   :  { %v125_v43 = vsel %vm52_vm0, %v124_v32, %v117_v35  ;;  %v137_v47 = vsel %vm52_vm0, %v136_v37, %v129_v41  ;;  %v562_v3 = vld [vmem:[%s632_s3] ss:$0 sm:$0xff]  ;;  %v171_v12 = vld [vmem:[#allocation2 + $0x8] sm:$0x1]  ;;  %v179_v13 = vld [vmem:[#allocation2 + $0x9] sm:$0x1] }
  0x27   :  { %v172_v7 = vld [vmem:[#allocation2 + $0x20] sm:$0x1]  ;;  %v205_v14 = vld [vmem:[#allocation2 + $0x23] sm:$0x1]  ;;  %v192_v16 = vld [vmem:[#allocation2 + $0xa] sm:$0x1] }
  0x28   :  { %v175_v10 = vrot.slane %v172_v7, 7  ;;  %v204_v21 = vld [vmem:[#allocation2 + $0xb] sm:$0x1]  ;;  %v229_v22 = vld [vmem:[#allocation2 + $0x25] sm:$0x1]  ;;  %s505_s2 = smov [#allocation7]  }
  0x29   :  { %131 = vrot.lane.b32.xlu0 %v44_v0, %s504_s5  ;;  %v235_v32 = vrot.slane %v229_v22, 7  ;;  %v228_v35 = vld [vmem:[#allocation2 + $0xd] sm:$0x1]  ;;  %v302_v22 = vld [vmem:[#allocation2 + $0x12] sm:$0x1]  ;;  %s398_s3 = sshll.u32 %s505_s2, 4  ;;  %s399_s3 = int_to_ptr.vmem [resolvable:$true] %s398_s3 }
  0x2a   :  { %v176_v18 = vsel %vm52_vm0, %v175_v10, %v171_v12  ;;  %s468_s10 = scalar_lea.vmem %s399_s3, 32  ;;  %p473_p11 = scmp.lt.s32.totalorder %s399_s3, %s399_s3 }
  0x2b   :  { %p469_p10 = scmp.ne.s32.totalorder %s399_s3, %s468_s10  ;;  %p474_p12 = scmp.lt.s32.totalorder %s468_s10, %s468_s10 }
  0x2d   :  { %p475_p13 = por %p474_p12, %p473_p11 }
  0x2f   :  { %p476_p0 = pnand %p475_p13, %p469_p10 }
  0x8f   :  { %v60_v15 = vpop.permute.xlu0 %59  ;;  %v84_v17 = vpop.permute.xlu1 %83 }
  0x90   :  { %v67_v20 = vmul.f32 %v65_v11, %v60_v15  ;;  %v91_v38 = vmul.f32 %v89_v28, %v84_v17  ;;  %v187_v11 = vrot.slane %v180_v8, 7  ;;  %v199_v15 = vrot.slane %v193_v9, 7  ;;  %v217_v17 = vld [vmem:[#allocation2 + $0x24] sm:$0x1] }
  0x91   :  { %v223_v26 = vrot.slane %v217_v17, 7 }
  0x92   :  { %v68_v33 = vadd.f32 %v67_v20, %v55_v19  ;;  %v188_v19 = vsel %vm52_vm0, %v187_v11, %v179_v13  ;;  %v211_v20 = vrot.slane %v205_v14, 7  ;;  %v200_v23 = vsel %vm52_vm0, %v199_v15, %v192_v16  ;;  %v290_v14 = vld [vmem:[#allocation2 + $0x29] sm:$0x1]  ;;  %v303_v15 = vld [vmem:[#allocation2 + $0x2a] sm:$0x1] }
  0x93   :  { %v72_v29 = vpop.permute.xlu0 %71  ;;  %v96_v31 = vpop.permute.xlu1 %95  ;;  %v297_v17 = vrot.slane %v290_v14, 7 }
  0x94   :  { %v79_v34 = vmul.f32 %v77_v24, %v72_v29  ;;  %v103_v40 = vmul.f32 %v101_v30, %v96_v31  ;;  %v216_v29 = vld [vmem:[#allocation2 + $0xc] sm:$0x1]  ;;  %v241_v30 = vld [vmem:[#allocation2 + $0x26] sm:$0x1]  ;;  %v212_v31 = vsel %vm52_vm0, %v211_v20, %v204_v21  ;;  %v315_v20 = vld [vmem:[#allocation2 + $0x2b] sm:$0x1] }
  0x95   :  { %v309_v21 = vrot.slane %v303_v15, 7 }
  0x96   :  { %v80_v39 = vadd.f32 %v79_v34, %v68_v33 }
  0x97   :  { %v108_v42 = vpop.permute.xlu0 %107  ;;  %v120_v44 = vpop.permute.xlu1 %119 }
  0x98   :  { %v92_v45 = vadd.f32 %v91_v38, %v80_v39  ;;  %v115_v46 = vmul.f32 %v113_v36, %v108_v42  ;;  %v127_v49 = vmul.f32 %v125_v43, %v120_v44  ;;  %v253_v36 = vld [vmem:[#allocation2 + $0x27] sm:$0x1]  ;;  %v224_v38 = vsel %vm52_vm0, %v223_v26, %v216_v29  ;;  %v240_v43 = vld [vmem:[#allocation2 + $0xe] sm:$0x1] }
  0x99   :  { %v236_v44 = vsel %vm52_vm0, %v235_v32, %v228_v35  ;;  %v321_v26 = vrot.slane %v315_v20, 7  ;;  %v310_v29 = vsel %vm52_vm0, %v309_v21, %v302_v22  ;;  %v326_v35 = vld [vmem:[#allocation2 + $0x14] sm:$0x1] }
  0x9a   :  { %v104_v48 = vadd.f32 %v103_v40, %v92_v45  ;;  %v247_v40 = vrot.slane %v241_v30, 7  ;;  %v259_v45 = vrot.slane %v253_v36, 7  ;;  %v351_v36 = vld [vmem:[#allocation2 + $0x2e] sm:$0x1] }
  0x9b   :  { %v132_v50 = vpop.permute.xlu0 %131 }
  0x9c   :  { %v116_v51 = vadd.f32 %v115_v46, %v104_v48  ;;  %v139_v52 = vmul.f32 %v137_v47, %v132_v50  ;;  %v252_v48 = vld [vmem:[#allocation2 + $0xf] sm:$0x1]  ;;  %v248_v50 = vsel %vm52_vm0, %v247_v40, %v240_v43 }
  0x9e   :  { %v128_v53 = vadd.f32 %v127_v49, %v116_v51 }
  0xa0   :  { %v140_v54 = vadd.f32 %v139_v52, %v128_v53 }
  0xa2   :  { %v142_v55 = vsel %vm141_vm1, %v140_v54, 0.0 }
  0xa3   :  { %143 = vadd.xlane.f32.xlu1 %v142_v55 }
 0x12c   :  { %v144_v56 = vpop.xlane.xlu1 %143 }
 0x12d   :  { %v145_v57 = vmul.f32 0.0078125, %v144_v56 }
 0x12f   :  { %v146_v58 = vsub.f32 %v140_v54, %v145_v57  ;;  %v260_v54 = vsel %vm52_vm0, %v259_v45, %v252_v48 }
 0x131   :  { %v147_v59 = vmul.f32 %v146_v58, %v146_v58 }
 0x133   :  { %v148_v60 = vsel %vm141_vm1, %v147_v59, 0.0 }
 0x134   :  { %149 = vadd.xlane.f32.xlu0 %v148_v60 }
 0x1bd   :  { %v150_v61 = vpop.xlane.xlu0 %149 }
 0x1be   :  { %v151_v62 = vmul.f32 0.0078125, %v150_v61 }
 0x1c0   :  { %v152_v63 = vadd.f32 1e-05, %v151_v62 }
 0x1c2   :  { %422 = vrsqrt.f32 %v152_v63 }
 0x1cf   :  { %v423_v0 = vpop.eup %422 }
 0x1d0   :  { %v154_v2 = vmul.f32 %v423_v0, %v146_v58 }
 0x1d2   :  { %v161_v4 = vmul.f32 %v557_v1, %v154_v2 }
 0x1d4   :  { %v168_v5 = vadd.f32 %v562_v3, %v161_v4 }
 0x1d6   :  { %v566_v6 = vmax.f32 %v168_v5, 0.0 }
 0x1d8   :  { %194 = vrot.lane.b32.xlu1 %v566_v6, %s500_s28  ;;  %182 = vrot.lane.b32.xlu0 %v566_v6, %s498_s0  ;;  %v178_v27 = vmul.f32 %v176_v18, %v566_v6  ;;  %v281_v18 = vld [vmem:[#allocation2 + $0x10] sm:$0x1] }
 0x1dc   :  { %206 = vrot.lane.b32.xlu1 %v566_v6, %s499_s27  ;;  %218 = vrot.lane.b32.xlu0 %v566_v6, %s501_s29 }
 0x1e0   :  { %230 = vrot.lane.b32.xlu1 %v566_v6, %s502_s30  ;;  %242 = vrot.lane.b32.xlu0 %v566_v6, %s503_s1 }
 0x1e4   :  { %254 = vrot.lane.b32.xlu1 %v566_v6, %s504_s5 }
 0x24a   :  { %v195_v24 = vpop.permute.xlu1 %194  ;;  %v183_v25 = vpop.permute.xlu0 %182 }
 0x24b   :  { %v190_v28 = vmul.f32 %v188_v19, %v183_v25  ;;  %v202_v33 = vmul.f32 %v200_v23, %v195_v24  ;;  %v289_v19 = vld [vmem:[#allocation2 + $0x11] sm:$0x1]  ;;  %v327_v23 = vld [vmem:[#allocation2 + $0x2c] sm:$0x1] }
 0x24c   :  { %v298_v25 = vsel %vm52_vm0, %v297_v17, %v289_v19  ;;  %v333_v32 = vrot.slane %v327_v23, 7 }
 0x24d   :  { %v191_v34 = vadd.f32 %v190_v28, %v178_v27  ;;  %v314_v27 = vld [vmem:[#allocation2 + $0x13] sm:$0x1]  ;;  %v339_v28 = vld [vmem:[#allocation2 + $0x2d] sm:$0x1] }
 0x24e   :  { %v207_v37 = vpop.permute.xlu1 %206  ;;  %v219_v39 = vpop.permute.xlu0 %218  ;;  %v334_v43 = vsel %vm52_vm0, %v333_v32, %v326_v35 }
 0x24f   :  { %v203_v41 = vadd.f32 %v202_v33, %v191_v34  ;;  %v214_v42 = vmul.f32 %v212_v31, %v207_v37  ;;  %v226_v47 = vmul.f32 %v224_v38, %v219_v39  ;;  %v322_v37 = vsel %vm52_vm0, %v321_v26, %v314_v27 }
 0x250   :  { %v345_v38 = vrot.slane %v339_v28, 7 }
 0x251   :  { %v215_v46 = vadd.f32 %v214_v42, %v203_v41  ;;  %v338_v41 = vld [vmem:[#allocation2 + $0x15] sm:$0x1]  ;;  %v363_v42 = vld [vmem:[#allocation2 + $0x2f] sm:$0x1] }
 0x252   :  { %v231_v49 = vpop.permute.xlu1 %230  ;;  %v243_v51 = vpop.permute.xlu0 %242 }
 0x253   :  { %v227_v52 = vadd.f32 %v226_v47, %v215_v46  ;;  %v238_v53 = vmul.f32 %v236_v44, %v231_v49  ;;  %v250_v56 = vmul.f32 %v248_v50, %v243_v51  ;;  %v357_v46 = vrot.slane %v351_v36, 7  ;;  %v350_v49 = vld [vmem:[#allocation2 + $0x16] sm:$0x1] }
 0x254   :  { %v346_v50 = vsel %vm52_vm0, %v345_v38, %v338_v41  ;;  %v369_v51 = vrot.slane %v363_v42, 7 }
 0x255   :  { %v239_v55 = vadd.f32 %v238_v53, %v227_v52 }
 0x256   :  { %v255_v57 = vpop.permute.xlu1 %254 }
 0x257   :  { %v251_v58 = vadd.f32 %v250_v56, %v239_v55  ;;  %v262_v59 = vmul.f32 %v260_v54, %v255_v57  ;;  %v362_v54 = vld [vmem:[#allocation2 + $0x17] sm:$0x1]  ;;  %v358_v55 = vsel %vm52_vm0, %v357_v46, %v350_v49 }
 0x259   :  { %v263_v60 = vadd.f32 %v262_v59, %v251_v58 }
 0x25b   :  { %v264_v61 = vsel %vm141_vm1, %v263_v60, 0.0 }
 0x25c   :  { %265 = vadd.xlane.f32.xlu0 %v264_v61 }
 0x2e5   :  { %v266_v62 = vpop.xlane.xlu0 %265 }
 0x2e6   :  { %v267_v63 = vmul.f32 0.0078125, %v266_v62 }
 0x2e8   :  { %v268_v0 = vsub.f32 %v263_v60, %v267_v63  ;;  %v370_v60 = vsel %vm52_vm0, %v369_v51, %v362_v54 }
 0x2ea   :  { %v269_v2 = vmul.f32 %v268_v0, %v268_v0 }
 0x2ec   :  { %v270_v4 = vsel %vm141_vm1, %v269_v2, 0.0 }
 0x2ed   :  { %271 = vadd.xlane.f32.xlu1 %v270_v4 }
 0x376   :  { %v272_v5 = vpop.xlane.xlu1 %271 }
 0x377   :  { %v273_v7 = vmul.f32 0.0078125, %v272_v5 }
 0x379   :  { %v274_v8 = vadd.f32 1e-05, %v273_v7 }
 0x37b   :  { %424 = vrsqrt.f32 %v274_v8 }
 0x388   :  { %v425_v9 = vpop.eup %424 }
 0x389   :  { %v276_v10 = vmul.f32 %v425_v9, %v268_v0 }
 0x38b   :  { %v277_v11 = vmul.f32 %v557_v1, %v276_v10 }
 0x38d   :  { %v278_v12 = vadd.f32 %v562_v3, %v277_v11 }
 0x38f   :  { %v596_v13 = vadd.f32 %v278_v12, %v566_v6  ;;  %v282_v6 = vld [vmem:[#allocation2 + $0x28] sm:$0x1] }
 0x390   :  { %v285_v16 = vrot.slane %v282_v6, 7 }
 0x391   :  { %304 = vrot.lane.b32.xlu1 %v596_v13, %s500_s28  ;;  %292 = vrot.lane.b32.xlu0 %v596_v13, %s498_s0 }
 0x392   :  { %v286_v24 = vsel %vm52_vm0, %v285_v16, %v281_v18 }
 0x393   :  { %v288_v33 = vmul.f32 %v286_v24, %v596_v13 }
 0x395   :  { %328 = vrot.lane.b32.xlu1 %v596_v13, %s501_s29  ;;  %316 = vrot.lane.b32.xlu0 %v596_v13, %s499_s27 }
 0x399   :  { %352 = vrot.lane.b32.xlu1 %v596_v13, %s503_s1  ;;  %340 = vrot.lane.b32.xlu0 %v596_v13, %s502_s30 }
 0x39d   :  { %364 = vrot.lane.b32.xlu0 %v596_v13, %s504_s5 }
 0x403   :  { %v305_v30 = vpop.permute.xlu1 %304  ;;  %v293_v31 = vpop.permute.xlu0 %292 }
 0x404   :  { %v300_v34 = vmul.f32 %v298_v25, %v293_v31  ;;  %v312_v39 = vmul.f32 %v310_v29, %v305_v30 }
 0x406   :  { %v301_v40 = vadd.f32 %v300_v34, %v288_v33 }
 0x407   :  { %v329_v44 = vpop.permute.xlu1 %328  ;;  %v317_v45 = vpop.permute.xlu0 %316 }
 0x408   :  { %v313_v47 = vadd.f32 %v312_v39, %v301_v40  ;;  %v324_v48 = vmul.f32 %v322_v37, %v317_v45  ;;  %v336_v52 = vmul.f32 %v334_v43, %v329_v44 }
 0x40a   :  { %v325_v53 = vadd.f32 %v324_v48, %v313_v47 }
 0x40b   :  { %v353_v56 = vpop.permute.xlu1 %352  ;;  %v341_v57 = vpop.permute.xlu0 %340 }
 0x40c   :  { %v337_v58 = vadd.f32 %v336_v52, %v325_v53  ;;  %v348_v59 = vmul.f32 %v346_v50, %v341_v57  ;;  %v360_v61 = vmul.f32 %v358_v55, %v353_v56 }
 0x40e   :  { %v349_v62 = vadd.f32 %v348_v59, %v337_v58 }
 0x40f   :  { %v365_v63 = vpop.permute.xlu0 %364 }
 0x410   :  { %v372_v0 = vmul.f32 %v370_v60, %v365_v63  ;;  %v361_v2 = vadd.f32 %v360_v61, %v349_v62 }
 0x412   :  { %v373_v4 = vadd.f32 %v372_v0, %v361_v2 }
 0x414   :  { %v374_v5 = vsel %vm141_vm1, %v373_v4, 0.0 }
 0x415   :  { %375 = vadd.xlane.f32.xlu1 %v374_v5 }
 0x49e   :  { %v376_v7 = vpop.xlane.xlu1 %375 }
 0x49f   :  { %v377_v8 = vmul.f32 0.0078125, %v376_v7 }
 0x4a1   :  { %v378_v9 = vsub.f32 %v373_v4, %v377_v8 }
 0x4a3   :  { %v379_v10 = vmul.f32 %v378_v9, %v378_v9 }
 0x4a5   :  { %v380_v11 = vsel %vm141_vm1, %v379_v10, 0.0 }
 0x4a6   :  { %381 = vadd.xlane.f32.xlu0 %v380_v11 }
 0x52f   :  { %v382_v12 = vpop.xlane.xlu0 %381 }
 0x530   :  { %v383_v6 = vmul.f32 0.0078125, %v382_v12 }
 0x532   :  { %v384_v14 = vadd.f32 1e-05, %v383_v6 }
 0x534   :  { %426 = vrsqrt.f32 %v384_v14 }
 0x541   :  { %v427_v15 = vpop.eup %426 }
 0x542   :  { %v386_v16 = vmul.f32 %v427_v15, %v378_v9 }
 0x544   :  { %v387_v17 = vmul.f32 %v557_v1, %v386_v16 }
 0x546   :  { %v388_v18 = vadd.f32 %v562_v3, %v387_v17 }
 0x548   :  { %v389_v19 = vmax.f32 %v388_v18, 0.0 }
 0x54a   :  { %v390_v20 = vadd.f32 %v389_v19, %v596_v13 }
 0x54c   :  { %391 = vst [vmem:[#allocation7] sm:$0x3] %v390_v20 }
 0x54d   :  { %479 = shalt.err (!%p476_p0)
}
 0x54e   :  { %401 = dma.vmem_to_hbm [thread:$0]  %s399_s3, 32, %s633_s4, [#allocation4]  }
 0x54f   :  { %492 = dma.done.wait [#allocation4], 32  }
 0x550   :  { %493 = vsyncadd [#allocation4], 4294967264 }
 0x551   :  { %405 = vsyncpa [#allocation3], 1 }
 0x552   :  { %406 = vsyncpa [#allocation6], 1 }
 0x553   :  { %407 = vsyncpa [#allocation4], 1 }

</bundles_post_ra>
